<compile_context>
chip_gen: v6e
topology: v6e:2x2x1
jax: 0.10.0
libtpu: 0.0.40
codegen_flags: <defaults>
</compile_context>

<pallas_src>
import functools

import jax
import jax.numpy as jnp
from jax import lax
from jax.experimental import pallas as pl
from jax.experimental.pallas import tpu as pltpu


def _matmul_bias_kernel(p_ref, w_ref, b_ref, o_ref):
    # p_ref: (TM, Kp)   bf16 im2col patch rows (one row per output pixel)
    # w_ref: (Cout, Kp) bf16 packed weights (kh-major, kw, cin-minor; zero-padded)
    # b_ref: (Cout, 1)  f32 bias
    # o_ref: (Cout, TM) f32 lane-dense output block
    acc = lax.dot_general(
        w_ref[...], p_ref[...],
        dimension_numbers=(((1,), (1,)), ((), ())),   # contract both minor dims
        preferred_element_type=jnp.float32)           # (Cout, TM), f32 accumulate
    o_ref[...] = (acc + b_ref[...]).astype(o_ref.dtype)


def _num_row_blocks(rows):
    """2 parallel row blocks on v7x (2 TensorCores/chip), 1 on single-TC v5e/v6e."""
    try:
        kind = jax.devices()[0].device_kind.lower()
    except Exception:
        return 1
    n_tc = 2 if "v7" in kind else 1
    if n_tc > 1 and rows % n_tc == 0 and (rows // n_tc) % 128 == 0:
        return n_tc
    return 1


@functools.partial(jax.jit,
                   static_argnames=("padding", "grid_steps", "compute_dtype"))
def conv2d_pallas(x_nchw, w_oihw, bias, *, padding=1, grid_steps=1,
                  compute_dtype=jnp.bfloat16):
    """Stride-1 2D conv, NCHW in / NCHW out (PyTorch nn.Conv2d semantics)."""
    N, Cin, H, W = x_nchw.shape
    Cout, _, KH, KW = w_oihw.shape
    Hp, Wp = H + 2 * padding, W + 2 * padding
    Ho, Wo = Hp - KH + 1, Wp - KW + 1            # == H, W for "same" conv
    HW = Ho * Wo
    R = N * HW                                   # total output pixels = matmul rows
    K = KH * KW * Cin                            # folded contraction dim
    Kp = -(-K // 128) * 128                      # lane-dense (zero-padded) K

    # ---- producer fusion: transpose + pad + bf16 cast + im2col, all fused by
    # XLA into one HBM write of `patch` before the kernel reads it. -----------
    x = jnp.transpose(x_nchw, (0, 2, 3, 1)).astype(compute_dtype)   # NHWC
    x = jnp.pad(x, ((0, 0), (padding, padding), (padding, padding), (0, 0)))
    pieces = [x[:, kh:kh + Ho, kw:kw + Wo, :]
              for kh in range(KH) for kw in range(KW)]
    patch = jnp.concatenate(pieces, axis=-1)               # (N, Ho, Wo, K)
    patch = patch.reshape(R, K)
    if Kp > K:
        patch = jnp.pad(patch, ((0, 0), (0, Kp - K)))      # (R, Kp)

    # Weights packed (Cout, KH*KW*Cin), kh-major / kw / cin-minor -- matching the
    # patch column order above -- then zero-padded on the contraction dim.
    w = jnp.transpose(w_oihw, (0, 2, 3, 1)).reshape(Cout, K).astype(compute_dtype)
    if Kp > K:
        w = jnp.pad(w, ((0, 0), (0, Kp - K)))              # (Cout, Kp)
    b = bias.reshape(Cout, 1).astype(jnp.float32)

    # Row-block grid: 1 step on single-TC chips (v5e/v6e), 2 parallel steps on
    # v7x so each TensorCore gets half the rows.
    G = grid_steps
    if G < 1 or R % G != 0 or (R // G) % 128 != 0:
        G = 1
    TM = R // G

    flops = 2 * Cout * R * Kp
    bytes_accessed = ((R * Kp + Cout * Kp) * 2   # bf16 patch + weights
                      + Cout * 4                 # bias
                      + Cout * R * 4)            # f32 output

    out = pl.pallas_call(
        _matmul_bias_kernel,
        out_shape=jax.ShapeDtypeStruct((Cout, R), jnp.float32),
        grid=(G,),
        in_specs=[
            pl.BlockSpec((TM, Kp), lambda i: (i, 0)),
            pl.BlockSpec((Cout, Kp), lambda i: (0, 0)),
            pl.BlockSpec((Cout, 1), lambda i: (0, 0)),
        ],
        out_specs=pl.BlockSpec((Cout, TM), lambda i: (0, i)),
        compiler_params=pltpu.CompilerParams(
            dimension_semantics=("parallel",)),
        cost_estimate=pl.CostEstimate(flops=flops, transcendentals=0,
                                      bytes_accessed=bytes_accessed),
    )(patch, w, b)

    # (Cout, N*HW) -> (N, Cout, Ho, Wo): tiny (16 KB here) epilogue, fused by XLA.
    return jnp.transpose(out.reshape(Cout, N, Ho, Wo), (1, 0, 2, 3))


class WrappedConvPallas:
    """JAX/Pallas port of WrappedConv's forward pass."""
    # Class attributes, matching the PyTorch module (it also writes the class
    # attribute `WrappedConv.features`).
    features = None
    grad = None

    def __init__(self, weight, bias, padding=1, compute_dtype=jnp.bfloat16):
        self.weight = weight
        self.bias = bias
        self.padding = padding
        self.compute_dtype = compute_dtype

    def __call__(self, x):
        N, _, H, W = x.shape
        _, _, KH, KW = self.weight.shape
        Ho = H + 2 * self.padding - KH + 1
        Wo = W + 2 * self.padding - KW + 1
        grid_steps = _num_row_blocks(N * Ho * Wo)
        y = conv2d_pallas(x, self.weight, self.bias,
                          padding=self.padding, grid_steps=grid_steps,
                          compute_dtype=self.compute_dtype)
        WrappedConvPallas.features = y[0]
        # TODO(synk): the backward grad hook (record_grad) has no forward-pass
        # Pallas equivalent; in JAX it would be captured via jax.vjp/custom_vjp.
        return y


if __name__ == "__main__":
    # Shapes implied by a typical wrapped conv: nn.Conv2d(4, 8, 3, padding=1)
    N, Cin, H, W = 2, 4, 16, 16
    Cout, KH, KW = 8, 3, 3
    padding = 1

    key = jax.random.PRNGKey(0)
    kx, kw_, kb = jax.random.split(key, 3)
    x = jax.random.normal(kx, (N, Cin, H, W), dtype=jnp.float32)
    weight = jax.random.normal(kw_, (Cout, Cin, KH, KW), dtype=jnp.float32) * 0.1
    bias = jax.random.normal(kb, (Cout,), dtype=jnp.float32) * 0.1

    module = WrappedConvPallas(weight, bias, padding=padding)
    y = jax.block_until_ready(module(x))

    # Reference: XLA conv with the same bf16 operands / f32 accumulation that the
    # kernel uses, so the comparison only reflects summation order.
    ref = lax.conv_general_dilated(
        x.astype(jnp.bfloat16), weight.astype(jnp.bfloat16),
        window_strides=(1, 1),
        padding=((padding, padding), (padding, padding)),
        dimension_numbers=("NCHW", "OIHW", "NCHW"),
        preferred_element_type=jnp.float32) + bias.reshape(1, -1, 1, 1)
    ref = jax.block_until_ready(ref)

    assert y.shape == (N, Cout, H, W), y.shape
    assert y.dtype == jnp.float32, y.dtype
    assert WrappedConvPallas.features.shape == (Cout, H, W)
    max_err = float(jnp.max(jnp.abs(y - ref)))
    assert jnp.allclose(y, ref, atol=2e-2, rtol=2e-2), max_err
    print("KERNEL_OK")
</pallas_src>

<mosaic_0001>
module attributes {stable_mosaic.version = 11 : i64} {
  func.func @_matmul_bias_kernel(%arg0: i32, %arg1: memref<512x128xbf16, #tpu.memory_space<vmem>>, %arg2: memref<8x128xbf16, #tpu.memory_space<vmem>>, %arg3: memref<8x1xf32, #tpu.memory_space<vmem>>, %arg4: memref<8x512xf32, #tpu.memory_space<vmem>>) attributes {dimension_semantics = [#tpu.dimension_semantics<parallel>], iteration_bounds = array<i64: 1>, scalar_prefetch = 0 : i64, scratch_operands = 0 : i64, tpu.core_type = #tpu.core_type<tc>, window_params = [{transform_indices = @transform_0, window_bounds = array<i64: 512, 128>}, {pipeline_mode = #tpu.pipeline_mode<synchronous>, transform_indices = @transform_1, window_bounds = array<i64: 8, 128>}, {pipeline_mode = #tpu.pipeline_mode<synchronous>, transform_indices = @transform_2, window_bounds = array<i64: 8, 1>}, {transform_indices = @transform_3, window_bounds = array<i64: 8, 512>}]} {
    %c0 = arith.constant 0 : index
    %c0_0 = arith.constant 0 : index
    %0 = vector.load %arg2[%c0, %c0_0] : memref<8x128xbf16, #tpu.memory_space<vmem>>, vector<8x128xbf16>
    %c0_1 = arith.constant 0 : index
    %c0_2 = arith.constant 0 : index
    %1 = vector.load %arg1[%c0_1, %c0_2] : memref<512x128xbf16, #tpu.memory_space<vmem>>, vector<512x128xbf16>
    %cst = arith.constant dense<0.000000e+00> : vector<8x512xf32>
    %2 = tpu.matmul %0, %1, %cst {dimension_numbers = #tpu.dot_dimension_numbers<[1], [1], [0], [0], [0, 0, 1, 0], [], []>} : vector<8x128xbf16>, vector<512x128xbf16>, vector<8x512xf32> -> vector<8x512xf32>
    %c0_3 = arith.constant 0 : index
    %c0_4 = arith.constant 0 : index
    %3 = vector.load %arg3[%c0_3, %c0_4] : memref<8x1xf32, #tpu.memory_space<vmem>>, vector<8x1xf32>
    %4 = vector.broadcast %3 : vector<8x1xf32> to vector<8x512xf32>
    %5 = arith.addf %2, %4 : vector<8x512xf32>
    %c0_5 = arith.constant 0 : index
    %c0_6 = arith.constant 0 : index
    %6 = vector.load %arg4[%c0_5, %c0_6] : memref<8x512xf32, #tpu.memory_space<vmem>>, vector<8x512xf32>
    tpu.vector_store %arg4[%c0_5, %c0_6], %5 {strides = array<i32>} : memref<8x512xf32, #tpu.memory_space<vmem>>, vector<8x512xf32>,
    return
  }
  func.func @transform_0(%arg0: i32) -> (i32, i32) {
    %c0_i32 = arith.constant 0 : i32
    %c0_i32_0 = arith.constant 0 : i32
    return %arg0, %c0_i32 : i32, i32
  }
  func.func @transform_1(%arg0: i32) -> (i32, i32) {
    %c0_i32 = arith.constant 0 : i32
    %c0_i32_0 = arith.constant 0 : i32
    %c0_i32_1 = arith.constant 0 : i32
    return %c0_i32, %c0_i32_0 : i32, i32
  }
  func.func @transform_2(%arg0: i32) -> (i32, i32) {
    %c0_i32 = arith.constant 0 : i32
    %c0_i32_0 = arith.constant 0 : i32
    %c0_i32_1 = arith.constant 0 : i32
    return %c0_i32, %c0_i32_0 : i32, i32
  }
  func.func @transform_3(%arg0: i32) -> (i32, i32) {
    %c0_i32 = arith.constant 0 : i32
    %c0_i32_0 = arith.constant 0 : i32
    return %c0_i32, %arg0 : i32, i32
  }
}

</mosaic_0001>

<bundles_post_ra>
// kernel: conv2d_pallas.1
= control target key start
LH: loop header
LB: loop body
LE: loop exit
PB: predicated region body
PF: predicated region fallthrough
CT: control target
= control target key end

     0   :  { %v470_v1 = vmov 0   ;;  %s605_s0 = inlined_call_operand.vmem [shape: bf16[512,128], index: 0, kind: input, shape index: {}]   ;;  %s606_s1 = inlined_call_operand.vmem [shape: bf16[8,128], index: 1, kind: input, shape index: {}]   ;;  %s607_s2 = inlined_call_operand.vmem [shape: f32[8,1], index: 2, kind: input, shape index: {}]   ;;  %s608_s3 = inlined_call_operand.vmem [shape: f32[8,512], index: 3, kind: output, shape index: {}]  }
   0x1   :  { %v438_v0 = vld [vmem:[%s605_s0 + $0x78] sm:$0xff]   ;;  %437 = vset.pattern.permute.xlu0 %v470_v1  ;;  %v442_v5 = vld [vmem:[%s605_s0 + $0x70] sm:$0xff]   ;;  %v446_v9 = vld [vmem:[%s605_s0 + $0x68] sm:$0xff]  }
   0x2   :  { %v439_v2 = vld [vmem:[%s605_s0 + $0xf8] sm:$0xff]   ;;  %400 = vmatprep.subr.bf16.mxu0 %v438_v0  ;;  %v443_v6 = vld [vmem:[%s605_s0 + $0xf0] sm:$0xff]   ;;  %v447_v10 = vld [vmem:[%s605_s0 + $0xe8] sm:$0xff]  }
   0x3   :  { %v440_v3 = vld [vmem:[%s605_s0 + $0x38] sm:$0xff]   ;;  %418 = vmatprep.subr.bf16.mxu1 %v439_v2  ;;  %v444_v7 = vld [vmem:[%s605_s0 + $0x30] sm:$0xff]   ;;  %v448_v11 = vld [vmem:[%s605_s0 + $0x28] sm:$0xff]  }
   0x4   :  { %v441_v4 = vld [vmem:[%s605_s0 + $0xb8] sm:$0xff]   ;;  %401 = vmatpush3.bf16.xpose.msra.mxu0 %v440_v3  ;;  %v445_v8 = vld [vmem:[%s605_s0 + $0xb0] sm:$0xff]   ;;  %v449_v12 = vld [vmem:[%s605_s0 + $0xa8] sm:$0xff]  }
   0x5   :  { %419 = vmatpush3.bf16.xpose.msra.mxu1 %v441_v4  ;;  %402 = vmatprep.subr.bf16.mxu0 %v442_v5  ;;  %v450_v13 = vld [vmem:[%s605_s0 + $0x60] sm:$0xff]   ;;  %v454_v17 = vld [vmem:[%s605_s0 + $0x58] sm:$0xff]   ;;  %v458_v23 = vld [vmem:[%s605_s0 + $0x50] sm:$0xff]  }
   0x6   :  { %420 = vmatprep.subr.bf16.mxu1 %v443_v6  ;;  %v451_v14 = vld [vmem:[%s605_s0 + $0xe0] sm:$0xff]   ;;  %v455_v18 = vld [vmem:[%s605_s0 + $0xd8] sm:$0xff]   ;;  %v459_v24 = vld [vmem:[%s605_s0 + $0xd0] sm:$0xff]  }
   0x7   :  { %v452_v15 = vld [vmem:[%s605_s0 + $0x20] sm:$0xff]   ;;  %v456_v19 = vld [vmem:[%s605_s0 + $0x18] sm:$0xff]   ;;  %v460_v25 = vld [vmem:[%s605_s0 + $0x10] sm:$0xff]  }
   0x8   :  { %v453_v16 = vld [vmem:[%s605_s0 + $0xa0] sm:$0xff]   ;;  %v457_v22 = vld [vmem:[%s605_s0 + $0x98] sm:$0xff]   ;;  %v461_v26 = vld [vmem:[%s605_s0 + $0x90] sm:$0xff]  }
   0x9   :  { %v15_v20 = vld [vmem:[%s606_s1] sm:$0xf]  ;;  %v462_v27 = vld [vmem:[%s605_s0 + $0x48] sm:$0xff]  }
   0xa   :  { %v80_v21 = vld [vmem:[%s607_s2] sm:$0xff]  ;;  %416 = vmatprep.mubr.bf16.mxu0 %v15_v20  ;;  %434 = vmatprep.mubr.bf16.mxu1 %v15_v20  ;;  %v463_v28 = vld [vmem:[%s605_s0 + $0xc8] sm:$0xff]  }
   0xb   :  { %83 = vperm.xlu0 %437, %v80_v21   ;;  %v464_v29 = vld [vmem:[%s605_s0 + $0x8] sm:$0xff]   ;;  %v466_v31 = vld [vmem:[%s605_s0 + $0x40] sm:$0xff]  }
   0xc   :  { %403 = vmatpush3.bf16.xpose.msra.mxu0 %v444_v7  ;;  %v465_v30 = vld [vmem:[%s605_s0 + $0x88] sm:$0xff]   ;;  %v467_v32 = vld [vmem:[%s605_s0 + $0xc0] sm:$0xff]  }
   0xd   :  { %421 = vmatpush3.bf16.xpose.msra.mxu1 %v445_v8  ;;  %404 = vmatprep.subr.bf16.mxu0 %v446_v9  ;;  %v468_v33 = vld [vmem:[%s605_s0] sm:$0xff]  }
   0xe   :  { %422 = vmatprep.subr.bf16.mxu1 %v447_v10  ;;  %v469_v34 = vld [vmem:[%s605_s0 + $0x80] sm:$0xff]  }
  0x14   :  { %405 = vmatpush3.bf16.xpose.msra.mxu0 %v448_v11 }
  0x15   :  { %423 = vmatpush3.bf16.xpose.msra.mxu1 %v449_v12  ;;  %406 = vmatprep.subr.bf16.mxu0 %v450_v13 }
  0x16   :  { %424 = vmatprep.subr.bf16.mxu1 %v451_v14 }
  0x1c   :  { %407 = vmatpush3.bf16.xpose.msra.mxu0 %v452_v15 }
  0x1d   :  { %425 = vmatpush3.bf16.xpose.msra.mxu1 %v453_v16  ;;  %408 = vmatprep.subr.bf16.mxu0 %v454_v17 }
  0x1e   :  { %426 = vmatprep.subr.bf16.mxu1 %v455_v18 }
  0x24   :  { %409 = vmatpush3.bf16.xpose.msra.mxu0 %v456_v19 }
  0x25   :  { %427 = vmatpush3.bf16.xpose.msra.mxu1 %v457_v22  ;;  %410 = vmatprep.subr.bf16.mxu0 %v458_v23 }
  0x26   :  { %428 = vmatprep.subr.bf16.mxu1 %v459_v24 }
  0x2c   :  { %411 = vmatpush3.bf16.xpose.msra.mxu0 %v460_v25 }
  0x2d   :  { %429 = vmatpush3.bf16.xpose.msra.mxu1 %v461_v26  ;;  %412 = vmatprep.subr.bf16.mxu0 %v462_v27 }
  0x2e   :  { %430 = vmatprep.subr.bf16.mxu1 %v463_v28 }
  0x34   :  { %413 = vmatpush3.bf16.xpose.msra.mxu0 %v464_v29 }
  0x35   :  { %431 = vmatpush3.bf16.xpose.msra.mxu1 %v465_v30  ;;  %414 = vmatprep.subr.bf16.mxu0 %v466_v31 }
  0x36   :  { %432 = vmatprep.subr.bf16.mxu1 %v467_v32 }
  0x3c   :  { %415 = vmatpush3.bf16.xpose.msra.mxu0 %v468_v33 }
  0x3d   :  { %433 = vmatpush3.bf16.xpose.msra.mxu1 %v469_v34 }
  0x43   :  { %417 = vmatmul.mubr.bf16.vlgmr.msra.gmra.mxu0 %v15_v20 }
  0x44   :  { %435 = vmatmul.mubr.bf16.vlgmr.msra.gmra.mxu1 %v15_v20 }
  0x86   :  { %v84_v35 = vpop.permute.xlu0 %83 }
 0x103   :  { %v312_v36 = vpop.f32.mrf.mxu0 }
 0x104   :  { %v313_v37 = vadd.f32 %v312_v36, %v84_v35  ;;  %v353_v38 = vpop.f32.mrf.mxu1 }
 0x105   :  { %v354_v39 = vadd.f32 %v353_v38, %v84_v35  ;;  %v314_v40 = vpop.f32.mrf.mxu0 }
 0x106   :  { %360 = vst [vmem:[%s608_s3] sm:$0xff] %v313_v37  ;;  %v315_v41 = vadd.f32 %v314_v40, %v84_v35  ;;  %v355_v42 = vpop.f32.mrf.mxu1 }
 0x107   :  { %362 = vst [vmem:[%s608_s3 + $0x10] sm:$0xff] %v354_v39  ;;  %v356_v43 = vadd.f32 %v355_v42, %v84_v35  ;;  %v316_v44 = vpop.f32.mrf.mxu0 }
 0x108   :  { %361 = vst [vmem:[%s608_s3 + $0x8] sm:$0xff] %v315_v41  ;;  %v357_v45 = vpop.f32.mrf.mxu1 }
 0x109   :  { %363 = vst [vmem:[%s608_s3 + $0x18] sm:$0xff] %v356_v43  ;;  %v317_v46 = vpop.f32.mrf.mxu0 }
 0x10a   :  { %v358_v47 = vpop.f32.mrf.mxu1 }

</bundles_post_ra>
